<compile_context>
chip_gen: v5e
topology: v5e:2x2
jax: 0.10.0
libtpu: 0.0.40
codegen_flags: <defaults>
</compile_context>

<pallas_src>
import functools

import jax
import jax.numpy as jnp
from jax import lax
from jax.experimental import pallas as pl
from jax.experimental.pallas import tpu as pltpu


def _focal_loss_kernel(*refs, gamma, hw, tile_hw, j_inner, needs_mask,
                       has_alpha):
    if has_alpha:
        logits_ref, target_ref, alpha_ref, out_ref, acc_ref = refs
    else:
        logits_ref, target_ref, out_ref, acc_ref = refs
        alpha_ref = None

    ji = pl.program_id(2)                                  # inner spatial tile

    @pl.when(ji == 0)
    def _():
        acc_ref[...] = jnp.zeros_like(acc_ref)

    x = logits_ref[...].astype(jnp.float32)                # (1, C, t)
    tgt = target_ref[...].astype(jnp.int32)                # (1, 1, t)
    _, C, t = x.shape

    # numerically stable softmax pieces along the class (sublane) axis;
    # exp(z) is computed once and reused for both lse and pt.
    m = jnp.max(x, axis=1, keepdims=True)                  # (1, 1, t)
    z = x - m
    expz = jnp.exp(z)                                      # C exps / pixel
    sumexp = jnp.sum(expz, axis=1, keepdims=True)

    # one-hot select (no dynamic gather across sublanes)
    classes = lax.broadcasted_iota(jnp.int32, (1, C, t), 1)
    onehot = classes == tgt                                # (1, C, t)

    sel_z = jnp.sum(jnp.where(onehot, z, 0.0), axis=1, keepdims=True)
    sel_e = jnp.sum(jnp.where(onehot, expz, 0.0), axis=1, keepdims=True)

    logpt = sel_z - jnp.log(sumexp)                        # (1, 1, t)
    pt = sel_e / sumexp                                    # exact divide

    one_minus_pt = 1.0 - pt
    if float(gamma) == int(gamma):
        focal = lax.integer_pow(one_minus_pt, int(gamma))  # stays on the VPU
    else:
        focal = one_minus_pt ** jnp.float32(gamma)

    if has_alpha:
        at = jnp.sum(jnp.where(onehot, alpha_ref[...], 0.0),
                     axis=1, keepdims=True)                # (1, 1, t)
        logpt = logpt * at

    loss = -1.0 * focal * logpt                            # (1, 1, t)

    if needs_mask:
        # Only the globally-last (ragged) tile and any overrun tiles pay the
        # iota/compare/select; interior tiles take the cheap branch.
        jo = pl.program_id(1)
        start = (jo * j_inner + ji) * tile_hw

        @pl.when(start + tile_hw <= hw)
        def _():
            acc_ref[...] += loss[0]                        # lane-wise VPU add

        @pl.when(start + tile_hw > hw)
        def _():
            cols = start + lax.broadcasted_iota(jnp.int32, (1, 1, t), 2)
            # where() selects, so garbage/NaN in padded lanes cannot leak.
            acc_ref[...] += jnp.where(cols < hw, loss, 0.0)[0]
    else:
        acc_ref[...] += loss[0]

    @pl.when(ji == pl.num_programs(2) - 1)
    def _():
        out_ref[...] = jnp.sum(acc_ref[...]).reshape(1, 1, 1)


def _split_tiles(num_tiles, n_batch):
    """Split the spatial-tile axis into (outer 'parallel', inner 'arbitrary').

    Gives a v7x dual-TC chip something to shard even when N is small; on
    v5e/v6e (single TC) this is neutral.  Overrun tiles (outer*inner >
    num_tiles) are handled by index clamping + in-kernel masking.
    """
    if num_tiles <= 1:
        return 1, max(num_tiles, 1)
    want = max(1, -(-8 // max(n_batch, 1)))      # target ~8 parallel units
    j_outer = min(num_tiles, want, 8)
    j_inner = -(-num_tiles // j_outer)
    return j_outer, j_inner


def focal_loss(logits_nchw, target_nhw, *, gamma=2, alpha=None,
               size_average=True, tile_hw=None):
    """Pallas TPU implementation of FocalLoss.forward.

    logits_nchw: (N, C, H, W) float logits (streamed in native dtype, cast to
                 f32 inside the kernel after the DMA)
    target_nhw : (N, H, W) integer class ids in [0, C)
    returns    : scalar float32 loss (mean if size_average else sum)

    NOTE: out-of-range target ids (e.g. an ignore_index such as 255) are not
    skipped; like the PyTorch gather, their contribution is undefined.
    """
    N, C, H, W = logits_nchw.shape
    HW = H * W

    # Free reshapes only: no transpose / cast / pad passes over HBM for logits.
    x = logits_nchw.reshape(N, C, HW)
    # Narrow target stream: 1 B (or 2 B) per pixel instead of 4 B of HBM traffic.
    if C <= 127:
        tgt_dtype = jnp.int8
    elif C <= 32767:
        tgt_dtype = jnp.int16
    else:
        tgt_dtype = jnp.int32
    t = target_nhw.reshape(N, 1, HW).astype(tgt_dtype)

    itemsize = jnp.dtype(x.dtype).itemsize
    # Padded per-lane-column VMEM bytes: logits double-buffer with C padded to
    # the sublane pack (8/f32, 16/bf16, 32/i8) + targets double-buffer (pads to
    # 32 B/col regardless of dtype) + the f32 accumulator row (pads to 8 rows).
    sub = max(1, 32 // itemsize)
    c_pad = -(-C // sub) * sub
    per_col = 2 * c_pad * itemsize + 2 * 32 + 32

    if tile_hw is None:
        # Size for overlap by HBM bytes (~8 MiB slab), bound by padded VMEM
        # bytes (~32 MiB budget); no artificial lane cap.
        tile = min((32 << 20) // per_col,
                   max((8 << 20) // max(C * itemsize, 1), 128))
        tile = max(128, (tile // 128) * 128)
        tile_hw = HW if HW <= tile else tile
    # Explicit scoped-VMEM limit: avoids v5e's 16 MiB default OOM, stays under
    # v7x's 64 MiB physical VMEM.
    vmem_limit = int(min(max(per_col * tile_hw + (8 << 20), 32 << 20), 48 << 20))

    num_tiles = pl.cdiv(HW, tile_hw)
    j_outer, j_inner = _split_tiles(num_tiles, N)
    needs_mask = (j_outer * j_inner * tile_hw != HW)
    last_tile = num_tiles - 1

    def tile_idx(jo, ji):
        # Clamp overrun tiles onto the last real block so their DMAs stay
        # in-bounds; the kernel masks their contribution to zero.
        return jnp.minimum(jo * j_inner + ji, last_tile)

    has_alpha = alpha is not None
    inputs = [x, t]
    in_specs = [
        pl.BlockSpec((1, C, tile_hw), lambda n, jo, ji: (n, 0, tile_idx(jo, ji))),
        pl.BlockSpec((1, 1, tile_hw), lambda n, jo, ji: (n, 0, tile_idx(jo, ji))),
    ]
    if has_alpha:
        if isinstance(alpha, (float, int)):
            assert C == 2, "scalar alpha implies binary classification (C == 2)"
            alpha_vec = jnp.array([float(alpha), 1.0 - float(alpha)], jnp.float32)
        else:
            alpha_vec = jnp.asarray(alpha, jnp.float32).reshape(C)
        inputs.append(alpha_vec.reshape(1, C, 1))
        in_specs.append(pl.BlockSpec((1, C, 1), lambda n, jo, ji: (0, 0, 0)))

    kernel = functools.partial(
        _focal_loss_kernel, gamma=gamma, hw=HW, tile_hw=tile_hw,
        j_inner=j_inner, needs_mask=needs_mask, has_alpha=has_alpha)

    cost = pl.CostEstimate(
        flops=int(N * HW * (6 * C + 12)),
        transcendentals=int(N * HW * (C + 2)),
        bytes_accessed=int(N * HW * (C * itemsize + jnp.dtype(tgt_dtype).itemsize)
                           + N * j_outer * 4),
    )

    partials = pl.pallas_call(
        kernel,
        out_shape=jax.ShapeDtypeStruct((N * j_outer, 1, 1), jnp.float32),
        grid_spec=pltpu.PrefetchScalarGridSpec(
            num_scalar_prefetch=0,
            grid=(N, j_outer, j_inner),
            in_specs=in_specs,
            out_specs=pl.BlockSpec((1, 1, 1),
                                   lambda n, jo, ji: (n * j_outer + jo, 0, 0)),
            scratch_shapes=[pltpu.VMEM((1, tile_hw), jnp.float32)],
        ),
        compiler_params=pltpu.CompilerParams(
            # N and outer-spatial axes: independent partials -> parallel
            # (megacore / v7x dual-TC).  Inner spatial axis: reduction.
            dimension_semantics=("parallel", "parallel", "arbitrary"),
            vmem_limit_bytes=vmem_limit),
        cost_estimate=cost,
    )(*inputs)

    total = jnp.sum(partials)
    if size_average:
        total = total / jnp.float32(N * HW)
    return total


def _focal_loss_ref(logits_nchw, target_nhw, gamma=2, alpha=None,
                    size_average=True):
    """Pure-JAX reference mirroring the PyTorch module, for sanity checking."""
    N, C, H, W = logits_nchw.shape
    x = jnp.transpose(logits_nchw.reshape(N, C, H * W), (0, 2, 1)).reshape(-1, C)
    t = target_nhw.reshape(-1).astype(jnp.int32)
    logp = jax.nn.log_softmax(x.astype(jnp.float32), axis=1)
    logpt = jnp.take_along_axis(logp, t[:, None], axis=1)[:, 0]
    pt = jnp.exp(logpt)
    if alpha is not None:
        if isinstance(alpha, (float, int)):
            a = jnp.array([float(alpha), 1.0 - float(alpha)], jnp.float32)
        else:
            a = jnp.asarray(alpha, jnp.float32)
        logpt = logpt * a[t]
    loss = -1.0 * (1.0 - pt) ** gamma * logpt
    return loss.mean() if size_average else loss.sum()


if __name__ == "__main__":
    key = jax.random.PRNGKey(0)
    k1, k2, k3, k4 = jax.random.split(key, 4)

    # Case 1: default FocalLoss(): gamma=2, alpha=None, size_average=True.
    N, C, H, W = 2, 4, 16, 16
    logits = jax.random.normal(k1, (N, C, H, W), dtype=jnp.float32)
    target = jax.random.randint(k2, (N, H, W), 0, C, dtype=jnp.int32)
    loss = jax.block_until_ready(
        focal_loss(logits, target, gamma=2, alpha=None, size_average=True))
    ref = _focal_loss_ref(logits, target, gamma=2, alpha=None, size_average=True)
    assert jnp.allclose(loss, ref, rtol=1e-5, atol=1e-6), (loss, ref)

    # Case 2: alpha vector + sum reduction path.
    alpha = [0.25, 0.75, 0.5, 0.5]
    loss2 = jax.block_until_ready(
        focal_loss(logits, target, gamma=2, alpha=alpha, size_average=False))
    ref2 = _focal_loss_ref(logits, target, gamma=2, alpha=alpha,
                           size_average=False)
    assert jnp.allclose(loss2, ref2, rtol=1e-5, atol=1e-5), (loss2, ref2)

    # Case 3: forced small tile -> exercises the outer/inner grid split,
    # the index-clamped overrun tile and the pl.when tail masking paths.
    N3, C3, H3, W3 = 3, 3, 8, 80
    logits3 = jax.random.normal(k3, (N3, C3, H3, W3), dtype=jnp.float32)
    target3 = jax.random.randint(k4, (N3, H3, W3), 0, C3, dtype=jnp.int32)
    loss3 = jax.block_until_ready(
        focal_loss(logits3, target3, gamma=2, alpha=None, size_average=True,
                   tile_hw=128))
    ref3 = _focal_loss_ref(logits3, target3, gamma=2, alpha=None,
                           size_average=True)
    assert jnp.allclose(loss3, ref3, rtol=1e-5, atol=1e-6), (loss3, ref3)

    print("KERNEL_OK")
</pallas_src>

<mosaic_0001>
module attributes {stable_mosaic.version = 11 : i64} {
  func.func @_focal_loss_kernel(%arg0: i32, %arg1: i32, %arg2: i32, %arg3: memref<1x4x256xf32, #tpu.memory_space<vmem>>, %arg4: memref<1x1x256xi8, #tpu.memory_space<vmem>>, %arg5: memref<1x1x1xf32, #tpu.memory_space<vmem>>, %arg6: memref<1x256xf32, #tpu.memory_space<vmem>>) attributes {dimension_semantics = [#tpu.dimension_semantics<parallel>, #tpu.dimension_semantics<parallel>, #tpu.dimension_semantics<arbitrary>], iteration_bounds = array<i64: 2, 1, 1>, scalar_prefetch = 0 : i64, scratch_operands = 1 : i64, tpu.core_type = #tpu.core_type<tc>, window_params = [{transform_indices = @transform_0, window_bounds = array<i64: 1, 4, 256>}, {transform_indices = @transform_1, window_bounds = array<i64: 1, 1, 256>}, {transform_indices = @transform_2, window_bounds = array<i64: 1, 1, 1>}]} {
    %c0_i32 = arith.constant 0 : i32
    %0 = arith.cmpi eq, %arg2, %c0_i32 : i32
    %1 = arith.extui %0 : i1 to i32
    %c0_i32_0 = arith.constant 0 : i32
    %2 = arith.cmpi ne, %1, %c0_i32_0 : i32
    scf.if %2 {
      %cst_19 = arith.constant 0.000000e+00 : f32
      %40 = vector.broadcast %cst_19 : f32 to vector<1x256xf32>
      %c0_20 = arith.constant 0 : index
      %c0_21 = arith.constant 0 : index
      %41 = vector.load %arg6[%c0_20, %c0_21] : memref<1x256xf32, #tpu.memory_space<vmem>>, vector<1x256xf32>
      tpu.vector_store %arg6[%c0_20, %c0_21], %40 {strides = array<i32>} : memref<1x256xf32, #tpu.memory_space<vmem>>, vector<1x256xf32>,
    } else {
    }
    %c0 = arith.constant 0 : index
    %c0_1 = arith.constant 0 : index
    %c0_2 = arith.constant 0 : index
    %3 = vector.load %arg3[%c0, %c0_1, %c0_2] : memref<1x4x256xf32, #tpu.memory_space<vmem>>, vector<1x4x256xf32>
    %c0_3 = arith.constant 0 : index
    %c0_4 = arith.constant 0 : index
    %c0_5 = arith.constant 0 : index
    %4 = vector.load %arg4[%c0_3, %c0_4, %c0_5] : memref<1x1x256xi8, #tpu.memory_space<vmem>>, vector<1x1x256xi8>
    %5 = arith.extsi %4 : vector<1x1x256xi8> to vector<1x1x256xi32>
    %cst = arith.constant dense<0xFF800000> : vector<1x256xf32>
    %6 = vector.multi_reduction <maximumf>, %3, %cst [1] : vector<1x4x256xf32> to vector<1x256xf32>
    %7 = vector.shape_cast %6 : vector<1x256xf32> to vector<1x1x256xf32>
    %8 = vector.broadcast %7 : vector<1x1x256xf32> to vector<1x4x256xf32>
    %9 = arith.subf %3, %8 : vector<1x4x256xf32>
    %10 = math.exp %9 : vector<1x4x256xf32>
    %cst_6 = arith.constant dense<0.000000e+00> : vector<1x256xf32>
    %11 = vector.multi_reduction <add>, %10, %cst_6 [1] : vector<1x4x256xf32> to vector<1x256xf32>
    %12 = vector.shape_cast %11 : vector<1x256xf32> to vector<1x1x256xf32>
    %13 = tpu.iota {dimensions = array<i32: 1>} : vector<1x4x256xi32>
    %14 = vector.broadcast %5 : vector<1x1x256xi32> to vector<1x4x256xi32>
    %15 = arith.cmpi eq, %13, %14 : vector<1x4x256xi32>
    %cst_7 = arith.constant 0.000000e+00 : f32
    %16 = vector.broadcast %cst_7 : f32 to vector<1x4x256xf32>
    %17 = arith.select %15, %9, %16 : vector<1x4x256xi1>, vector<1x4x256xf32>
    %cst_8 = arith.constant dense<0.000000e+00> : vector<1x256xf32>
    %18 = vector.multi_reduction <add>, %17, %cst_8 [1] : vector<1x4x256xf32> to vector<1x256xf32>
    %19 = vector.shape_cast %18 : vector<1x256xf32> to vector<1x1x256xf32>
    %cst_9 = arith.constant 0.000000e+00 : f32
    %20 = vector.broadcast %cst_9 : f32 to vector<1x4x256xf32>
    %21 = arith.select %15, %10, %20 : vector<1x4x256xi1>, vector<1x4x256xf32>
    %cst_10 = arith.constant dense<0.000000e+00> : vector<1x256xf32>
    %22 = vector.multi_reduction <add>, %21, %cst_10 [1] : vector<1x4x256xf32> to vector<1x256xf32>
    %23 = vector.shape_cast %22 : vector<1x256xf32> to vector<1x1x256xf32>
    %24 = math.log %12 : vector<1x1x256xf32>
    %25 = arith.subf %19, %24 : vector<1x1x256xf32>
    %26 = arith.divf %23, %12 : vector<1x1x256xf32>
    %cst_11 = arith.constant 1.000000e+00 : f32
    %27 = vector.broadcast %cst_11 : f32 to vector<1x1x256xf32>
    %28 = arith.subf %27, %26 : vector<1x1x256xf32>
    %29 = arith.mulf %28, %28 : vector<1x1x256xf32>
    %cst_12 = arith.constant -1.000000e+00 : f32
    %30 = vector.broadcast %cst_12 : f32 to vector<1x1x256xf32>
    %31 = arith.mulf %30, %29 : vector<1x1x256xf32>
    %32 = arith.mulf %31, %25 : vector<1x1x256xf32>
    %c0_13 = arith.constant 0 : index
    %c0_14 = arith.constant 0 : index
    %33 = vector.load %arg6[%c0_13, %c0_14] : memref<1x256xf32, #tpu.memory_space<vmem>>, vector<1x256xf32>
    %34 = vector.shape_cast %32 : vector<1x1x256xf32> to vector<1x256xf32>
    %35 = arith.addf %33, %34 : vector<1x256xf32>
    %c0_15 = arith.constant 0 : index
    %c0_16 = arith.constant 0 : index
    %36 = vector.load %arg6[%c0_15, %c0_16] : memref<1x256xf32, #tpu.memory_space<vmem>>, vector<1x256xf32>
    tpu.vector_store %arg6[%c0_15, %c0_16], %35 {strides = array<i32>} : memref<1x256xf32, #tpu.memory_space<vmem>>, vector<1x256xf32>,
    %c0_i32_17 = arith.constant 0 : i32
    %37 = arith.cmpi eq, %arg2, %c0_i32_17 : i32
    %38 = arith.extui %37 : i1 to i32
    %c0_i32_18 = arith.constant 0 : i32
    %39 = arith.cmpi ne, %38, %c0_i32_18 : i32
    scf.if %39 {
      %c0_19 = arith.constant 0 : index
      %c0_20 = arith.constant 0 : index
      %40 = vector.load %arg6[%c0_19, %c0_20] : memref<1x256xf32, #tpu.memory_space<vmem>>, vector<1x256xf32>
      %41 = vector.shape_cast %40 : vector<1x256xf32> to vector<1x1x256xf32>
      %cst_21 = arith.constant dense<0.000000e+00> : vector<1xf32>
      %42 = vector.multi_reduction <add>, %41, %cst_21 [1, 2] : vector<1x1x256xf32> to vector<1xf32>
      %43 = vector.shape_cast %42 : vector<1xf32> to vector<1x1x1xf32>
      %44 = vector.extract %43[0, 0, 0] : f32 from vector<1x1x1xf32>
      %45 = vector.broadcast %44 : f32 to vector<1x1x1xf32>
      %c0_22 = arith.constant 0 : index
      %c0_23 = arith.constant 0 : index
      %c0_24 = arith.constant 0 : index
      %46 = vector.load %arg5[%c0_22, %c0_23, %c0_24] : memref<1x1x1xf32, #tpu.memory_space<vmem>>, vector<1x1x1xf32>
      tpu.vector_store %arg5[%c0_22, %c0_23, %c0_24], %45 {strides = array<i32>} : memref<1x1x1xf32, #tpu.memory_space<vmem>>, vector<1x1x1xf32>,
    } else {
    }
    return
  }
  func.func @transform_0(%arg0: i32, %arg1: i32, %arg2: i32) -> (i32, i32, i32) {
    %c1_i32 = arith.constant 1 : i32
    %0 = arith.muli %arg1, %c1_i32 : i32
    %1 = arith.addi %0, %arg2 : i32
    %c0_i32 = arith.constant 0 : i32
    %2 = arith.minsi %1, %c0_i32 : i32
    %c0_i32_0 = arith.constant 0 : i32
    %c0_i32_1 = arith.constant 0 : i32
    return %arg0, %c0_i32_0, %2 : i32, i32, i32
  }
  func.func @transform_1(%arg0: i32, %arg1: i32, %arg2: i32) -> (i32, i32, i32) {
    %c1_i32 = arith.constant 1 : i32
    %0 = arith.muli %arg1, %c1_i32 : i32
    %1 = arith.addi %0, %arg2 : i32
    %c0_i32 = arith.constant 0 : i32
    %2 = arith.minsi %1, %c0_i32 : i32
    %c0_i32_0 = arith.constant 0 : i32
    %c0_i32_1 = arith.constant 0 : i32
    return %arg0, %c0_i32_0, %2 : i32, i32, i32
  }
  func.func @transform_2(%arg0: i32, %arg1: i32, %arg2: i32) -> (i32, i32, i32) {
    %c1_i32 = arith.constant 1 : i32
    %0 = arith.muli %arg0, %c1_i32 : i32
    %1 = arith.addi %0, %arg1 : i32
    %c0_i32 = arith.constant 0 : i32
    %c0_i32_0 = arith.constant 0 : i32
    %c0_i32_1 = arith.constant 0 : i32
    return %1, %c0_i32, %c0_i32_0 : i32, i32, i32
  }
}

</mosaic_0001>

<bundles_post_ra>
// kernel: tpu_custom_call.1
= control target key start
LH: loop header
LB: loop body
LE: loop exit
PB: predicated region body
PF: predicated region fallthrough
CT: control target
= control target key end

     0   :  { %7 = vsyncpa [#allocation4], 0  ;;  %s854_s0 = inlined_call_operand.hbm [shape: f32[2,4,256], index: 0, kind: input, shape index: {}]   ;;  %s855_s1 = inlined_call_operand.vmem [shape: s8[2,1,256], index: 1, kind: input, shape index: {}]   ;;  %s856_s2 = inlined_call_operand.vmem [shape: f32[2,1,1], index: 2, kind: output, shape index: {}]  }
   0x1   :  { %9 = vsyncpa [#allocation4 + $0x1], 0  ;;  %s718_s9 = smov 0   ;;  %s720_s10 = smov 0  }
   0x2   :  { %s722_s11 = smov 0   ;;  %s724_s12 = smov 0  }
   0x3   :  { %s726_s13 = smov 0   ;;  %s728_s14 = smov 0  }
   0x4 LB: > { %s539_s15 = sadd.s32 4294967295, %s700_s14   ;;  %s34_s16 = sadd.s32 1, %s696_s13  ;;  %s700_s14 = sphi %s728_s14, %s15_s14   ;;  %s696_s13 = sphi %s726_s13, %s871_s13   ;;  %s692_s12 = sphi %s724_s12, %s870_s12   ;;  %s688_s11 = sphi %s722_s11, %s869_s11   ;;  %s684_s10 = sphi %s720_s10, %s868_s10   ;;  %s680_s9 = sphi %s718_s9, %s867_s9  }
   0x5   : > { %p36_p0 = scmp.ge.s32.totalorder %s34_s16, 2  ;;  %s49_s17 = sadd.s32 1, %s688_s11 }
   0x6   : > { %p56_p1 = scmp.ne.s32.totalorder %s688_s11, %s684_s10  ;;  %p57_p2 = scmp.eq.s32.totalorder %s700_s14, 0 }
   0x7   : > { %s873_s16 = smov (%p36_p0, %s34_s16), 0  ;;  %p62_p4 = scmp.ne.s32.totalorder %s684_s10, %s680_s9 }
   0x8   : > { %p754_p3 = por %p57_p2, %p56_p1  ;;  %s44_s19 = ssub.s32 %s696_s13, %s873_s16 }
   0x9   : > { %p63_p5 = scmp.eq.s32.totalorder %s539_s15, 0  ;;  %p47_p6 = scmp.eq.s32.totalorder %s44_s19, 0 }
   0xa   : > { %p560_p8 = scmp.lt.s32.totalorder %s700_s14, 2  ;;  %s148_s22 = sand.u32 1, %s688_s11  }
   0xb   : > { %p761_p7 = por %p63_p5, %p62_p4  ;;  %s551_s23 = sshll.u32 %s696_s13, 3 }
   0xc   : > { %s767_s21 = scalar_select %p47_p6, %s688_s11, %s49_s17  }
   0xd   : > { %s543_s24 = sshll.u32 %s148_s22, 3  ;;  %s162_s27 = scalar_lea.hbm %s854_s0, %s551_s23 }
   0xe   : > { %s164_s28 = sshll.u32 %s162_s27, 4  ;;  %s152_s29 = scalar_lea.vmem [#allocation3], %s543_s24  ;;  %s165_s28 = int_to_ptr.hbm [resolvable:$true] %s164_s28 }
   0xf   : > { %s166_s30 = sshll.u32 %s152_s29, 4  ;;  %p557_p9 = pnand %p560_p8, %p754_p3  ;;  %s167_s30 = int_to_ptr.vmem [resolvable:$true] %s166_s30 }
  0x10   : > { %p546_p10 = scmp.ge.s32.totalorder %s700_s14, 1  ;;  %p189_p11 = scmp.lt.s32.totalorder %s700_s14, 3 }
  0x11   : > { %s149_s3 = scalar_lea.sflag [#allocation4], %s148_s22 }
  0x12   : > { %559 = dma.hbm_to_vmem [thread:$0]  (!%p557_p9), %s165_s28, 128, %s167_s30, %s149_s3  }
  0x13   : > { %p190_p12 = pnand %p546_p10, %p189_p11 }
  0x14   : > { %s195_s4 = sand.u32 (!%p190_p12), 1, %s684_s10  }
  0x15   : > { %193 = sbr.rel (%p190_p12) target bundleno = 310 (0x136), region = 28  ;;  %s547_s5 = sshll.u32 (!%p190_p12), %s195_s4, 3 }
  0x16   : > { %s196_s6 = scalar_lea.sflag (!%p190_p12), [#allocation4], %s195_s4  ;;  %s199_s7 = scalar_lea.vmem (!%p190_p12), [#allocation3], %s547_s5 }
  0x1a   : > { %675 = dma.done.wait (%p761_p7), %s196_s6, 128  }
  0x1b   : > { %677 = vsyncadd (%p761_p7), %s196_s6, 4294967168  ;;  %v259_v0 = vlaneseq  ;;  %v702_v2 = vmov 0.0   ;;  %v264_v3 = vld [vmem:[%s199_s7] sm:$0xff]  ;;  %vm273_vm1 = vcmask 1043456   ;;  %p239_p13 = scmp.lt.s32.totalorder %s692_s12, 1  ;;  %vm415_vm12 = vcmask 1040384  }
  0x1c   : > { %268 = vst [vmem:[#allocation1] ss:$2 sm:$0xff] %v264_v3  ;;  %vm446_vm13 = vcmask 0  }
  0x1d   : > { %vm783_vm0 = vcmp.lt.s32.totalorder %v259_v0, 256  ;;  %s875_s12 = smov (!%p239_p13, %s692_s12), 1  ;;  %v317_v35 = vshrl.u32 %v259_v0, 7 }
  0x1e   : > { %263 = vst.msk [vmem:[#allocation2] sm:$0x3] %vm783_vm0, %v702_v2  ;;  %s548_s8 = sshll.u32 %s875_s12, 1  ;;  %s253_s20 = scalar_lea.vmem %s856_s2, %s875_s12 }
  0x1f   : > { %s245_s17 = scalar_lea.vmem %s855_s1, %s548_s8 }
  0x20   : > { %v265_v25 = vld [vmem:[%s245_s17] sm:$0x3] }
  0x21   : > { %v266_v26 = vunpack.c.0.s8 %v265_v25 }
  0x23   : > { %v269_v4 = vld.sshfl [vmem:[#allocation1] sm:$0xff pattern:$0x75316420]  ;;  %v270_v5 = vld.sshfl [vmem:[#allocation1 + $0x8] sm:$0xff pattern:$0x75316420] }
  0x24   : > { %v274_v6 = vsel %vm273_vm1, %v269_v4, -inf  ;;  %v281_v7 = vsel %vm273_vm1, %v270_v5, -inf  ;;  %v318_v27 = vperm.slane %v266_v26, 0  ;;  %v319_v28 = vperm.slane %v266_v26, 4 }
  0x25   : > { %v275_v8 = vrot.slane %v274_v6, 4  ;;  %v282_v9 = vrot.slane %v281_v7, 4 }
  0x26   : > { %v320_v38 = vperm.slane %v318_v27, 0  ;;  %v321_v39 = vperm.slane %v319_v28, 0 }
  0x27   : > { %v276_v10 = vmax.f32 %v274_v6, %v275_v8  ;;  %v283_v11 = vmax.f32 %v281_v7, %v282_v9 }
  0x28   : > { %vm802_vm2 = vcmp.eq.s32.totalorder %v317_v35, %v320_v38  ;;  %vm806_vm3 = vcmp.eq.s32.totalorder %v317_v35, %v321_v39 }
  0x29   : > { %v277_v12 = vrot.slane %v276_v10, 2  ;;  %v284_v13 = vrot.slane %v283_v11, 2 }
  0x2b   : > { %v278_v14 = vmax.f32 %v276_v10, %v277_v12  ;;  %v285_v15 = vmax.f32 %v283_v11, %v284_v13 }
  0x2d   : > { %v279_v16 = vrot.slane %v278_v14, 1  ;;  %v286_v17 = vrot.slane %v285_v15, 1 }
  0x2f   : > { %v280_v18 = vmax.f32 %v278_v14, %v279_v16  ;;  %v287_v19 = vmax.f32 %v285_v15, %v286_v17 }
  0x31   : > { %v290_v20 = vrot.slane %v287_v19, 4 }
  0x33   : > { %v291_v21 = vsel %vm273_vm1, %v280_v18, %v290_v20 }
  0x34   : > { %v293_v22 = vsub.f32 %v264_v3, %v291_v21 }
  0x36   : > { %v294_v23 = vmul.f32 1.442695, %v293_v22 }
  0x38   : > { %610 = vpow2.f32 %v294_v23 }
  0x3e   : > { %v611_v24 = vpop.eup %610 }
  0x3f   : > { %297 = vst [vmem:[#allocation1] ss:$2 sm:$0xff] %v611_v24 }
  0x46   : > { %v298_v29 = vld.sshfl [vmem:[#allocation1] sm:$0xff pattern:$0x75316420]  ;;  %v299_v30 = vld.sshfl [vmem:[#allocation1 + $0x8] sm:$0xff pattern:$0x75316420] }
  0x47   : > { %v302_v31 = vsel %vm273_vm1, %v298_v29, 0.0  ;;  %v309_v32 = vsel %vm273_vm1, %v299_v30, 0.0  ;;  %325 = vst [vmem:[#allocation1] ss:$2 sm:$0xff] %v293_v22 }
  0x48   : > { %v303_v33 = vrot.slane %v302_v31, 4  ;;  %v310_v34 = vrot.slane %v309_v32, 4 }
  0x4a   : > { %v304_v36 = vadd.f32 %v303_v33, %v302_v31  ;;  %v311_v37 = vadd.f32 %v310_v34, %v309_v32 }
  0x4c   : > { %v305_v40 = vrot.slane %v304_v36, 2  ;;  %v312_v41 = vrot.slane %v311_v37, 2 }
  0x4e   : > { %v306_v42 = vadd.f32 %v305_v40, %v304_v36  ;;  %v313_v43 = vadd.f32 %v312_v41, %v311_v37  ;;  %v326_v46 = vld.sshfl [vmem:[#allocation1] sm:$0xff pattern:$0x75316420]  ;;  %v327_v47 = vld.sshfl [vmem:[#allocation1 + $0x8] sm:$0xff pattern:$0x75316420] }
  0x4f   : > { %v330_v48 = vsel %vm802_vm2, %v326_v46, 0.0  ;;  %v331_v49 = vsel %vm806_vm3, %v327_v47, 0.0  ;;  %346 = vst [vmem:[#allocation1] ss:$2 sm:$0xff] %v611_v24 }
  0x50   : > { %v307_v50 = vrot.slane %v306_v42, 1  ;;  %v332_v51 = vsel %vm273_vm1, %v330_v48, 0.0  ;;  %v339_v52 = vsel %vm273_vm1, %v331_v49, 0.0  ;;  %v314_v54 = vrot.slane %v313_v43, 1 }
  0x51   : > { %v333_v55 = vrot.slane %v332_v51, 4  ;;  %v340_v56 = vrot.slane %v339_v52, 4 }
  0x52   : > { %v308_v53 = vadd.f32 %v307_v50, %v306_v42  ;;  %v315_v57 = vadd.f32 %v314_v54, %v313_v43 }
  0x53   : > { %v334_v58 = vadd.f32 %v333_v55, %v332_v51  ;;  %v341_v63 = vadd.f32 %v340_v56, %v339_v52 }
  0x54   : > { %612 = vrcp.f32 %v308_v53  ;;  %v382_v10 = vand.u32 2147483647, %v308_v53  ;;  %v384_v14 = vand.u32 2147483648, %v308_v53  ;;  %vm378_vm4 = vweird.f32 %v308_v53 }
  0x55   : > { %v335_v5 = vrot.slane %v334_v58, 2  ;;  %614 = vrcp.f32 %v315_v57  ;;  %v342_v9 = vrot.slane %v341_v63, 2  ;;  %vm393_vm7 = vweird.f32 %v315_v57 }
  0x56   : > { %v347_v59 = vld.sshfl [vmem:[#allocation1] sm:$0xff pattern:$0x75316420]  ;;  %v348_v60 = vld.sshfl [vmem:[#allocation1 + $0x8] sm:$0xff pattern:$0x75316420]  ;;  %616 = vlog2.f32 %v308_v53 }
  0x57   : > { %v351_v61 = vsel %vm802_vm2, %v347_v59, 0.0  ;;  %v352_v62 = vsel %vm806_vm3, %v348_v60, 0.0  ;;  %v336_v15 = vadd.f32 %v335_v5, %v334_v58  ;;  %v343_v20 = vadd.f32 %v342_v9, %v341_v63  ;;  %v411_v60 = vld [vmem:[#allocation2] sm:$0x3] }
  0x58   : > { %v353_v0 = vsel %vm273_vm1, %v351_v61, 0.0  ;;  %v360_v2 = vsel %vm273_vm1, %v352_v62, 0.0  ;;  %618 = vlog2.f32 %v315_v57  ;;  %vm822_vm6 = vcmp.eq.f32.partialorder %v382_v10, 8.507059e+37 }
  0x59   : > { %v354_v3 = vrot.slane %v353_v0, 4  ;;  %v361_v4 = vrot.slane %v360_v2, 4  ;;  %v385_v24 = vor.u32 1.1754944e-38, %v384_v14  ;;  %v337_v27 = vrot.slane %v336_v15, 1 }
  0x5a   : > { %v613_v8 = vpop.eup %612  ;;  %v397_v29 = vand.u32 2147483647, %v315_v57  ;;  %v399_v30 = vand.u32 2147483648, %v315_v57  ;;  %v344_v34 = vrot.slane %v343_v20, 1 }
  0x5b   : > { %v355_v6 = vadd.f32 %v354_v3, %v353_v0  ;;  %v362_v7 = vadd.f32 %v361_v4, %v360_v2  ;;  %v374_v13 = vmul.f32 %v613_v8, %v308_v53  ;;  %vm379_vm5 = vweird.f32 %v613_v8  ;;  %v615_v19 = vpop.eup %614 }
  0x5c   : > { %v389_v25 = vmul.f32 %v615_v19, %v315_v57  ;;  %v617_v26 = vpop.eup %616  ;;  %vm380_vm8 = vmor %vm378_vm4, %vm379_vm5  ;;  %vm394_vm9 = vweird.f32 %v615_v19  ;;  %v338_v38 = vadd.f32 %v337_v27, %v336_v15  ;;  %v400_v41 = vor.u32 1.1754944e-38, %v399_v30 }
  0x5d   : > { %v356_v11 = vrot.slane %v355_v6, 2  ;;  %v363_v12 = vrot.slane %v362_v7, 2  ;;  %v375_v18 = vsub.f32 1.0, %v374_v13  ;;  %v368_v39 = vmul.f32 0.6931472, %v617_v26  ;;  %vm395_vm10 = vmor %vm393_vm7, %vm394_vm9 }
  0x5e   : > { %v390_v33 = vsub.f32 1.0, %v389_v25  ;;  %v619_v37 = vpop.eup %618  ;;  %vm398_vm11 = vcmp.eq.f32.partialorder %v397_v29, 8.507059e+37  ;;  %v345_v47 = vadd.f32 %v344_v34, %v343_v20 }
  0x5f   : > { %v357_v16 = vadd.f32 %v356_v11, %v355_v6  ;;  %v364_v17 = vadd.f32 %v363_v12, %v362_v7  ;;  %v376_v23 = vmul.f32 %v613_v8, %v375_v18  ;;  %v370_v49 = vmul.f32 0.6931472, %v619_v37 }
  0x60   : > { %v391_v36 = vmul.f32 %v615_v19, %v390_v33  ;;  %v371_v50 = vsub.f32 %v338_v38, %v368_v39 }
  0x61   : > { %v358_v22 = vrot.slane %v357_v16, 1  ;;  %v365_v28 = vrot.slane %v364_v17, 1  ;;  %v377_v32 = vadd.f32 %v613_v8, %v376_v23  ;;  %v372_v55 = vsub.f32 %v345_v47, %v370_v49 }
  0x62   : > { %v392_v44 = vadd.f32 %v615_v19, %v391_v36 }
  0x63   : > { %v359_v31 = vadd.f32 %v358_v22, %v357_v16  ;;  %v381_v35 = vsel %vm380_vm8, %v613_v8, %v377_v32  ;;  %v366_v42 = vadd.f32 %v365_v28, %v364_v17 }
  0x64   : > { %v386_v40 = vsel %vm822_vm6, %v385_v24, %v381_v35  ;;  %v396_v45 = vsel %vm395_vm10, %v615_v19, %v392_v44 }
  0x65   : > { %v387_v43 = vmul.f32 %v386_v40, %v359_v31  ;;  %v401_v48 = vsel %vm398_vm11, %v400_v41, %v396_v45 }
  0x66   : > { %v402_v51 = vmul.f32 %v401_v48, %v366_v42 }
  0x67   : > { %v403_v46 = vsub.f32 1.0, %v387_v43 }
  0x68   : > { %v404_v53 = vsub.f32 1.0, %v402_v51 }
  0x69   : > { %v405_v52 = vmul.f32 %v403_v46, %v403_v46 }
  0x6a   : > { %v406_v56 = vmul.f32 %v404_v53, %v404_v53 }
  0x6b   : > { %v407_v54 = vmul.f32 -1.0, %v405_v52 }
  0x6c   : > { %v408_v57 = vmul.f32 -1.0, %v406_v56 }
  0x6d   : > { %v409_v58 = vmul.f32 %v407_v54, %v371_v50 }
  0x6e   : > { %v410_v59 = vmul.f32 %v408_v57, %v372_v55 }
  0x70   : > { %v414_v61 = vrot.slane %v410_v59, 7 }
  0x72   : > { %v416_v62 = vsel %vm415_vm12, %v409_v58, %v414_v61 }
  0x73   : > { %v418_v63 = vadd.f32 %v416_v62, %v411_v60 }
  0x75   : > { %423 = vst.msk [vmem:[#allocation2] sm:$0x3] %vm783_vm0, %v418_v63 }
  0x7c   : > { %v427_v0 = vld [vmem:[#allocation2] sm:$0x3] }
  0x7d   : > { %v429_v2 = vperm.slane %v427_v0, 0  ;;  %v430_v3 = vperm.slane %v427_v0, 1 }
  0x7f   : > { %v433_v4 = vsel %vm415_vm12, %v429_v2, 0.0  ;;  %v434_v5 = vsel %vm415_vm12, %v430_v3, 0.0 }
  0x80   : > { %v435_v6 = vadd.f32 %v434_v5, %v433_v4 }
  0x82   : > { %436 = vadd.xlane.f32.xlu0 %v435_v6 }
  0xf5   : > { %v437_v7 = vpop.xlane.xlu0 %436 }
  0xf6   : > { %v438_v8 = vrot.slane %v437_v7, 4 }
  0xf8   : > { %v439_v9 = vadd.f32 %v438_v8, %v437_v7 }
  0xfa   : > { %v440_v10 = vrot.slane %v439_v9, 2 }
  0xfc   : > { %v441_v11 = vadd.f32 %v440_v10, %v439_v9 }
  0xfe   : > { %v442_v12 = vrot.slane %v441_v11, 1 }
 0x100   : > { %v443_v13 = vadd.f32 %v442_v12, %v441_v11 }
 0x102   : > { %552 = vpush %v443_v13 }
 0x133   : > { %s553_s22 = spop %552 }
 0x134   : > { %v445_v1 = vstv %s553_s22 }
 0x135   : > { %447 = vst.msk [vmem:[%s253_s20] sm:$0x1] %vm446_vm13, %v445_v1 }
 0x136 PF: > { %s15_s14 = sadd.s32 1, %s700_s14   ;;  %s867_s9 = smov %s684_s10 }
 0x137   : > { %p12_p0 = scmp.ge.s32.totalorder %s15_s14, 4   ;;  %s868_s10 = smov %s688_s11 }
 0x138   : > { %s869_s11 = smov %s767_s21  ;;  %s870_s12 = smov %s696_s13 }
 0x139   : > { %s871_s13 = smov %s873_s16  ;;  %14 = sbr.rel (!%p12_p0) target bundleno = 4 (0x4), region = 79 }
 0x13e   :  { %468 = vsyncpa [#allocation4], 1 }
 0x13f   :  { %470 = vsyncpa [#allocation4 + $0x1], 1 }

</bundles_post_ra>
